<compile_context>
chip_gen: v7x
topology: tpu7x:2x2x1
jax: 0.10.0
libtpu: 0.0.40
codegen_flags: <defaults>
</compile_context>

<pallas_src>
import math

import jax
import jax.numpy as jnp
from jax.experimental import pallas as pl
from jax.experimental.pallas import tpu as pltpu


def make_positional_encoding(d_model: int, max_len: int = 5000) -> jnp.ndarray:
    """Deterministic pe buffer, identical to the PyTorch __init__ math.

    Returns (max_len, 1, d_model), matching pe.unsqueeze(0).transpose(0, 1).
    """
    position = jnp.arange(0, max_len, dtype=jnp.float32)[:, None]            # (max_len, 1)
    div_term = jnp.exp(
        jnp.arange(0, d_model, 2, dtype=jnp.float32) * (-math.log(10000.0) / d_model)
    )                                                                          # (d_model//2,)
    angles = position * div_term                                               # (max_len, d_model//2)
    pe = jnp.zeros((max_len, d_model), dtype=jnp.float32)
    pe = pe.at[:, 0::2].set(jnp.sin(angles))
    pe = pe.at[:, 1::2].set(jnp.cos(angles))
    return pe[:, None, :]


_VMEM_LIMIT_BYTES = 32 * 1024 * 1024     # explicit cap (>= scoped default on all chips)
_BLOCK_TARGET_BYTES = 2 * 1024 * 1024    # ~2 MiB blocks: pipelined, amortizes per-step overhead


def _choose_row_tile(n_rows: int, row_bytes: int,
                     target_bytes: int = _BLOCK_TARGET_BYTES) -> int:
    """Row-tile size: block <= ~target_bytes, tile is a multiple of 8 sublanes
    (or covers all rows); exact divisors of n_rows are preferred so there is no
    ragged last block."""
    budget = max(8, target_bytes // max(1, row_bytes))
    if n_rows <= budget:
        return n_rows
    for ts in range((budget // 8) * 8, 0, -8):
        if n_rows % ts == 0:
            return ts
    # No multiple-of-8 divisor within budget: accept a ragged last block
    # (safe for an elementwise op; Pallas clips the partial block).
    return (budget // 8) * 8


def _pe_add_kernel_2d(x_ref, pe_ref, o_ref):
    # x_ref / pe_ref / o_ref: (ts, D) dense sublane x lane tiles; same-shape add.
    o_ref[...] = (x_ref[...] + pe_ref[...]).astype(o_ref.dtype)


def _pe_add_kernel_3d(x_ref, pe_ref, o_ref):
    # x_ref / o_ref: (ts, B, D); pe_ref: (ts, 1, D) -> broadcast over batch.
    x = x_ref[...]
    pe = pe_ref[...]
    o_ref[...] = (x + jnp.broadcast_to(pe, x.shape)).astype(o_ref.dtype)


def positional_encoding_forward(x: jnp.ndarray, pe: jnp.ndarray,
                                seq_tile: int | None = None) -> jnp.ndarray:
    """x: (S, B, D); pe: (max_len, 1, D). Returns x + pe[:S] (broadcast over batch)."""
    S, B, D = x.shape
    max_len = pe.shape[0]
    if S > max_len:
        raise ValueError(f"seq_len {S} exceeds max_len {max_len}")
    itemsize = jnp.dtype(x.dtype).itemsize

    # pe in the activation dtype.  If the dtype already matches, pass the FULL
    # buffer (no HBM copy; the BlockSpec index_map windows the first S rows).
    # Otherwise cast just the needed rows once (cache this at init in real use).
    if pe.dtype == x.dtype:
        pe_src = pe                                   # (max_len, 1, D), no copy
    else:
        pe_src = pe[:S].astype(x.dtype)               # (S, 1, D), one small copy

    compiler_params_2d = pltpu.CompilerParams(
        dimension_semantics=("parallel", "parallel"),
        vmem_limit_bytes=_VMEM_LIMIT_BYTES,
    )
    compiler_params_1d = pltpu.CompilerParams(
        dimension_semantics=("parallel",),
        vmem_limit_bytes=_VMEM_LIMIT_BYTES,
    )

    if D % 128 == 0:
        # ---- Lane-dense fast path -------------------------------------------
        # View x as (S, B*D); grid = (seq_tiles, batch).  Block (ts, D) of x2d
        # at block index (i, b) is exactly rows [i*ts, i*ts+ts) of batch b.
        x2d = x.reshape(S, B * D)                     # free row-major reshape
        pe2d = pe_src.reshape(pe_src.shape[0], D)
        pe_rows = pe2d.shape[0]

        ts = _choose_row_tile(S, D * itemsize)
        if seq_tile is not None:
            ts = min(seq_tile, S)
            assert ts == S or ts % 8 == 0, "seq_tile must be a multiple of 8 (or == S)"
        if ts % 8 != 0 and ts != pe_rows:
            # Tiny-S corner case: make the pe block cover its full row dim so the
            # (8,128)-or-full-dim block rule holds for the pe BlockSpec too.
            pe2d = pe2d[:S]
            pe_rows = S

        grid = (pl.cdiv(S, ts), B)                    # batch innermost -> pe block reused

        out2d = pl.pallas_call(
            _pe_add_kernel_2d,
            out_shape=jax.ShapeDtypeStruct((S, B * D), x.dtype),
            grid_spec=pltpu.PrefetchScalarGridSpec(
                num_scalar_prefetch=0,
                grid=grid,
                in_specs=[
                    pl.BlockSpec((ts, D), lambda i, b: (i, b)),   # x2d: batch b's columns
                    pl.BlockSpec((ts, D), lambda i, b: (i, 0)),   # pe: same rows, reused over b
                ],
                out_specs=pl.BlockSpec((ts, D), lambda i, b: (i, b)),
            ),
            compiler_params=compiler_params_2d,
        )(x2d, pe2d)
        return out2d.reshape(S, B, D)

    # ---- General path (any d_model / batch) ----------------------------------
    # Trailing block dims equal the full (B, D) array dims, so the (8,128) block
    # rule is always satisfied; pe broadcasts over batch inside the kernel.
    ts = _choose_row_tile(S, B * D * itemsize)
    if seq_tile is not None:
        ts = min(seq_tile, S)
    grid = (pl.cdiv(S, ts),)

    return pl.pallas_call(
        _pe_add_kernel_3d,
        out_shape=jax.ShapeDtypeStruct((S, B, D), x.dtype),
        grid_spec=pltpu.PrefetchScalarGridSpec(
            num_scalar_prefetch=0,
            grid=grid,
            in_specs=[
                pl.BlockSpec((ts, B, D), lambda i: (i, 0, 0)),
                pl.BlockSpec((ts, 1, D), lambda i: (i, 0, 0)),
            ],
            out_specs=pl.BlockSpec((ts, B, D), lambda i: (i, 0, 0)),
        ),
        compiler_params=compiler_params_1d,
    )(x, pe_src)


if __name__ == "__main__":
    max_len = 5000

    # Case 1: small shapes implied by the module (seq=8, batch=2, d_model=32).
    # Exercises the general (3-D broadcast) path.
    S, B, D = 8, 2, 32
    pe = make_positional_encoding(d_model=D, max_len=max_len)
    x = jax.random.normal(jax.random.PRNGKey(0), (S, B, D), dtype=jnp.float32)
    out = jax.block_until_ready(positional_encoding_forward(x, pe))
    ref = x + pe[:S]
    assert out.shape == (S, B, D)
    assert jnp.allclose(out, ref, atol=1e-6, rtol=1e-6)

    # Case 2: lane-dense path (d_model multiple of 128) with a multi-step,
    # pipelined (seq_tiles, batch) grid — grid = (4, 2).
    S2, B2, D2 = 64, 2, 128
    pe2 = make_positional_encoding(d_model=D2, max_len=max_len)
    x2 = jax.random.normal(jax.random.PRNGKey(0), (S2, B2, D2), dtype=jnp.float32)
    out2 = jax.block_until_ready(positional_encoding_forward(x2, pe2, seq_tile=16))
    ref2 = x2 + pe2[:S2]
    assert out2.shape == (S2, B2, D2)
    assert jnp.allclose(out2, ref2, atol=1e-6, rtol=1e-6)

    print("KERNEL_OK")
</pallas_src>

<mosaic_0001>
module attributes {stable_mosaic.version = 11 : i64} {
  func.func @_pe_add_kernel_3d(%arg0: i32, %arg1: memref<8x2x32xf32, #tpu.memory_space<vmem>>, %arg2: memref<8x1x32xf32, #tpu.memory_space<vmem>>, %arg3: memref<8x2x32xf32, #tpu.memory_space<vmem>>) attributes {dimension_semantics = [#tpu.dimension_semantics<parallel>], iteration_bounds = array<i64: 1>, scalar_prefetch = 0 : i64, scratch_operands = 0 : i64, tpu.core_type = #tpu.core_type<tc>, window_params = [{transform_indices = @transform_0, window_bounds = array<i64: 8, 2, 32>}, {transform_indices = @transform_1, window_bounds = array<i64: 8, 1, 32>}, {transform_indices = @transform_2, window_bounds = array<i64: 8, 2, 32>}]} {
    %c0 = arith.constant 0 : index
    %c0_0 = arith.constant 0 : index
    %c0_1 = arith.constant 0 : index
    %0 = vector.load %arg1[%c0, %c0_0, %c0_1] : memref<8x2x32xf32, #tpu.memory_space<vmem>>, vector<8x2x32xf32>
    %c0_2 = arith.constant 0 : index
    %c0_3 = arith.constant 0 : index
    %c0_4 = arith.constant 0 : index
    %1 = vector.load %arg2[%c0_2, %c0_3, %c0_4] : memref<8x1x32xf32, #tpu.memory_space<vmem>>, vector<8x1x32xf32>
    %2 = vector.shape_cast %1 : vector<8x1x32xf32> to vector<8x1x32xf32>
    %3 = vector.broadcast %2 : vector<8x1x32xf32> to vector<8x2x32xf32>
    %4 = arith.addf %0, %3 : vector<8x2x32xf32>
    %c0_5 = arith.constant 0 : index
    %c0_6 = arith.constant 0 : index
    %c0_7 = arith.constant 0 : index
    %5 = vector.load %arg3[%c0_5, %c0_6, %c0_7] : memref<8x2x32xf32, #tpu.memory_space<vmem>>, vector<8x2x32xf32>
    tpu.vector_store %arg3[%c0_5, %c0_6, %c0_7], %4 {strides = array<i32>} : memref<8x2x32xf32, #tpu.memory_space<vmem>>, vector<8x2x32xf32>,
    return
  }
  func.func @transform_0(%arg0: i32) -> (i32, i32, i32) {
    %c0_i32 = arith.constant 0 : i32
    %c0_i32_0 = arith.constant 0 : i32
    %c0_i32_1 = arith.constant 0 : i32
    return %arg0, %c0_i32, %c0_i32_0 : i32, i32, i32
  }
  func.func @transform_1(%arg0: i32) -> (i32, i32, i32) {
    %c0_i32 = arith.constant 0 : i32
    %c0_i32_0 = arith.constant 0 : i32
    %c0_i32_1 = arith.constant 0 : i32
    return %arg0, %c0_i32, %c0_i32_0 : i32, i32, i32
  }
  func.func @transform_2(%arg0: i32) -> (i32, i32, i32) {
    %c0_i32 = arith.constant 0 : i32
    %c0_i32_0 = arith.constant 0 : i32
    %c0_i32_1 = arith.constant 0 : i32
    return %arg0, %c0_i32, %c0_i32_0 : i32, i32, i32
  }
}

</mosaic_0001>

<bundles_post_ra>
// kernel: tpu_custom_call.1
= control target key start
LH: loop header
LB: loop body
LE: loop exit
PB: predicated region body
PF: predicated region fallthrough
CT: control target
= control target key end

     0   :  { %vm84_vm0 = vcmask 254976   ;;  %s230_s0 = inlined_call_operand.vmem [shape: f32[8,2,32], index: 0, kind: input, shape index: {}]   ;;  %s231_s1 = inlined_call_operand.vmem [shape: f32[5000,1,32], index: 1, kind: input, shape index: {}]   ;;  %s232_s2 = inlined_call_operand.hbm [shape: f32[8,2,32], index: 2, kind: output, shape index: {}]  }
   0x1   :  { %v12_v0 = vld [vmem:[%s230_s0] sm:$0x3]  ;;  %v13_v3 = vld [vmem:[%s230_s0 + $0x2] sm:$0x3]  ;;  %v14_v5 = vld [vmem:[%s230_s0 + $0x4] sm:$0x3] }
   0x2   :  { %v109_v1 = vld [vmem:[%s231_s1] ss:$0 sm:$0xff]  ;;  %v110_v4 = vld [vmem:[%s231_s1 + $0x1] ss:$0 sm:$0xff]  ;;  %v111_v7 = vld [vmem:[%s231_s1 + $0x2] ss:$0 sm:$0xff] }
   0x3   :  { %v76_v2 = vadd.f32 %v109_v1, %v12_v0  ;;  %v77_v6 = vadd.f32 %v110_v4, %v13_v3  ;;  %v15_v8 = vld [vmem:[%s230_s0 + $0x6] sm:$0x3]  ;;  %v112_v9 = vld [vmem:[%s231_s1 + $0x3] ss:$0 sm:$0xff]  ;;  %v78_v10 = vadd.f32 %v111_v7, %v14_v5  ;;  %v16_v12 = vld [vmem:[%s230_s0 + $0x8] sm:$0x3] }
   0x4   :  { %v79_v11 = vadd.f32 %v112_v9, %v15_v8  ;;  %v113_v13 = vld [vmem:[%s231_s1 + $0x4] ss:$0 sm:$0xff]  ;;  %v17_v14 = vld [vmem:[%s230_s0 + $0xa] sm:$0x3]  ;;  %v114_v16 = vld [vmem:[%s231_s1 + $0x5] ss:$0 sm:$0xff] }
   0x5   :  { %85 = vst.msk [vmem:[#allocation2] sm:$0x3] %vm84_vm0, %v76_v2  ;;  %86 = vst.msk [vmem:[#allocation2 + $0x2] sm:$0x3] %vm84_vm0, %v77_v6  ;;  %v80_v15 = vadd.f32 %v113_v13, %v16_v12  ;;  %v18_v17 = vld [vmem:[%s230_s0 + $0xc] sm:$0x3]  ;;  %v81_v19 = vadd.f32 %v114_v16, %v17_v14 }
   0x6   :  { %v115_v18 = vld [vmem:[%s231_s1 + $0x6] ss:$0 sm:$0xff]  ;;  %87 = vst.msk [vmem:[#allocation2 + $0x4] sm:$0x3] %vm84_vm0, %v78_v10  ;;  %88 = vst.msk [vmem:[#allocation2 + $0x6] sm:$0x3] %vm84_vm0, %v79_v11 }
   0x7   :  { %v82_v20 = vadd.f32 %v115_v18, %v18_v17  ;;  %v19_v21 = vld [vmem:[%s230_s0 + $0xe] sm:$0x3]  ;;  %v116_v22 = vld [vmem:[%s231_s1 + $0x7] ss:$0 sm:$0xff] }
   0x8   :  { %7 = vsyncpa [#allocation3], 0  ;;  %89 = vst.msk [vmem:[#allocation2 + $0x8] sm:$0x3] %vm84_vm0, %v80_v15  ;;  %v83_v23 = vadd.f32 %v116_v22, %v19_v21  ;;  %s144_s13 = smov [#allocation2]  }
   0x9   :  { %s98_s14 = sshll.u32 %s144_s13, 4  ;;  %90 = vst.msk [vmem:[#allocation2 + $0xa] sm:$0x3] %vm84_vm0, %v81_v19  ;;  %91 = vst.msk [vmem:[#allocation2 + $0xc] sm:$0x3] %vm84_vm0, %v82_v20  ;;  %s99_s14 = int_to_ptr.vmem [resolvable:$true] %s98_s14 }
   0xa   :  { %92 = vst.msk [vmem:[#allocation2 + $0xe] sm:$0x3] %vm84_vm0, %v83_v23  ;;  %s120_s15 = scalar_lea.vmem %s99_s14, 256  ;;  %p125_p1 = scmp.lt.s32.totalorder %s99_s14, %s99_s14 }
   0xb   :  { %p121_p0 = scmp.ne.s32.totalorder %s99_s14, %s120_s15  ;;  %p126_p2 = scmp.lt.s32.totalorder %s120_s15, %s120_s15 }
   0xd   :  { %p127_p3 = por %p126_p2, %p125_p1 }
   0xf   :  { %p128_p4 = pnand %p127_p3, %p121_p0 }
  0x11   :  { %131 = shalt.err (!%p128_p4)
}
  0x12   :  { %s132_s16 = scalar_lea.hbm %s232_s2, 256 }
  0x13   :  { %p133_p5 = scmp.ne.s32.totalorder %s232_s2, %s132_s16  ;;  %p136_p6 = scmp.lt.u32.totalorder %s132_s16, %s232_s2 }
  0x15   :  { %p138_p7 = pnand %p136_p6, %p133_p5 }
  0x17   :  { %141 = shalt.err (!%p138_p7)
}
  0x18   :  { %s145_s21 = smov 32   ;;  %s146_s22 = smov 2  }
  0x19   :  { %104 = dma.vmem_to_hbm [thread:$0]  %s99_s14, 256, %s232_s2, [#allocation3], %s145_s21, %s145_s21, %s146_s22  }
  0x1a   :  { %142 = dma.done.wait [#allocation3], 256  }
  0x1b   :  { %143 = vsyncadd [#allocation3], 4294967040 }
  0x1c   :  { %108 = vsyncpa [#allocation3], 1 }

</bundles_post_ra>
